<compile_context>
chip_gen: v6e
topology: v6e:2x2x1
jax: 0.10.0
libtpu: 0.0.40
codegen_flags: <defaults>
</compile_context>

<pallas_src>
import math
import functools

import jax
import jax.numpy as jnp
from jax.experimental import pallas as pl
from jax.experimental.pallas import tpu as pltpu


# ----------------------------------------------------------------------------- helpers

_SUBLANES = {4: 8, 2: 16, 1: 32}   # sublane count per 32-bit-packed dtype width


def _round_up(x: int, m: int) -> int:
    return ((x + m - 1) // m) * m


def _pe_table(d_model: int, max_seq_length: int) -> jnp.ndarray:
    """Replicates the PyTorch __init__ buffer `pe` of shape (1, max_seq, d_model)."""
    position = jnp.arange(max_seq_length, dtype=jnp.float32)[:, None]          # (S, 1)
    div_term = jnp.exp(
        jnp.arange(0, d_model, 2, dtype=jnp.float32) * (-math.log(10000.0) / d_model)
    )
    pe = jnp.zeros((1, max_seq_length, d_model), dtype=jnp.float32)
    pe = pe.at[0, :, 0::2].set(jnp.sin(position * div_term))
    # Guard odd d_model: cos term has ceil(D/2) columns, only floor(D/2) slots.
    pe = pe.at[0, :, 1::2].set((jnp.cos(position * div_term))[:, : d_model // 2])
    return pe


def prepare_pe_flat(pe: jnp.ndarray, seq_len: int, dtype) -> jnp.ndarray:
    """Slice + cast + flatten the PE buffer ONCE (cache per (seq_len, dtype)).

    Hoisted out of the per-call hot path so the table is not re-written to HBM on
    every forward.  Note: for bf16 inputs this adds a bf16 PE (PyTorch adds the
    fp32 buffer) — a deliberate, documented precision trade that halves PE traffic.
    """
    _, max_seq, d_model = pe.shape
    assert seq_len <= max_seq
    return pe[:, :seq_len, :].astype(dtype).reshape(1, seq_len * d_model)


def _choose_tiles(batch: int, n_cols: int, itemsize: int,
                  budget_bytes: int = 12 << 20, min_col_tiles: int = 2):
    """Pick (tile_rows, tile_cols) so the double-buffered VMEM footprint (including
    sublane padding of x, out and pe blocks) stays within `budget_bytes`."""
    sub = _SUBLANES.get(itemsize, 8)
    rows_pad = _round_up(batch, sub)
    # bytes per tile column, double buffered: x block + out block + (1, TC) pe block
    per_col = 2 * (2 * rows_pad + sub) * itemsize
    max_cols = budget_bytes // per_col

    if max_cols >= 128:
        # Column tiling only; all batch rows in one tile.
        tile_rows = batch
        max_cols_128 = (max_cols // 128) * 128
        if n_cols >= min_col_tiles * 128:
            # >= min_col_tiles tiles so v7x can shard the "parallel" axis over 2 TCs.
            want = _round_up(pl.cdiv(n_cols, min_col_tiles), 128)
            tile_cols = max(128, min(want, max_cols_128))
        elif n_cols <= max_cols:
            tile_cols = n_cols                     # full extent (always legal)
        else:
            tile_cols = max(128, max_cols_128)
    else:
        # Very large batch: even a 128-column full-row tile overflows the budget.
        # Tile the row dimension too (second "parallel" grid axis).
        tile_cols = 128 if n_cols >= 128 else n_cols
        tr = (budget_bytes // (2 * tile_cols * itemsize) - sub) // 2
        tile_rows = max(sub, (tr // sub) * sub)
        if tile_rows >= batch:
            tile_rows = batch
    return tile_rows, tile_cols


# ----------------------------------------------------------------------------- kernel

def _pos_enc_kernel(seed_ref, x_ref, pe_ref, o_ref, *,
                    p: float, training: bool, use_hw_prng: bool,
                    n_cols_total: int, tile_rows: int, tile_cols: int):
    """One (row tile, column tile) per grid step: out = dropout(x + pe)."""
    y = x_ref[...] + pe_ref[...]                       # (TR, TC) + (1, TC) broadcast, VPU

    if training and p > 0.0:
        threshold = jnp.uint32(int(round(p * (1 << 24))))

        if use_hw_prng:
            # Hardware PRNG: one seed per grid tile -> tiles stay independent, so the
            # "parallel" dimension semantics remain valid.
            pltpu.prng_seed(seed_ref[0], pl.program_id(0), pl.program_id(1))
            # Generate sublane-aligned rows and slice, to keep lowering trivial.
            pad_rows = _round_up(y.shape[0], 8)
            raw = pltpu.prng_random_bits((pad_rows, y.shape[1]))[: y.shape[0], :]
            bits = raw if raw.dtype == jnp.uint32 else pltpu.bitcast(raw, jnp.uint32)
        else:
            # Software counter-based hash fallback (interpret mode / non-TPU backend).
            # Row offsets are computed on a (TR, 1) column to avoid a full-width
            # per-element 32-bit multiply.
            row0 = pl.program_id(0) * tile_rows
            col0 = pl.program_id(1) * tile_cols
            row_off = (jax.lax.broadcasted_iota(jnp.int32, (y.shape[0], 1), 0) + row0) \
                      * n_cols_total
            cols = jax.lax.broadcasted_iota(jnp.int32, y.shape, 1) + col0
            idx = (row_off + cols).astype(jnp.uint32)
            seed = seed_ref[0].astype(jnp.uint32)
            h = idx ^ (seed * jnp.uint32(0x9E3779B9))
            h = h ^ (h >> 16)
            h = h * jnp.uint32(0x7FEB352D)
            h = h ^ (h >> 15)
            h = h * jnp.uint32(0x846CA68B)
            h = h ^ (h >> 16)
            bits = h

        keep = (bits & jnp.uint32(0x00FFFFFF)) >= threshold
        scale = jnp.asarray(1.0 / (1.0 - p), dtype=y.dtype)
        y = jnp.where(keep, y * scale, jnp.zeros_like(y))

    o_ref[...] = y.astype(o_ref.dtype)


# ----------------------------------------------------------------------------- wrapper

def positional_encoding_forward(
    x: jnp.ndarray,
    pe_flat: jnp.ndarray,
    *,
    p: float = 0.1,
    training: bool = True,
    seed: int = 0,
    use_hw_prng=None,
) -> jnp.ndarray:
    """x: (B, S, D).  pe_flat: (1, S*D) from prepare_pe_flat().  Returns dropout(x + pe)."""
    if training and p >= 1.0:
        raise ValueError("dropout p must be < 1.0 in training mode")
    B, S, D = x.shape
    N = S * D
    assert pe_flat.shape == (1, N), "pass prepare_pe_flat(pe, S, x.dtype)"

    itemsize = jnp.dtype(x.dtype).itemsize
    x2 = x.reshape(B, N)                      # free: merges contiguous trailing dims
    pe2 = pe_flat.astype(x.dtype)             # no-op when prepared with the right dtype
    seed_arr = jnp.array([seed], dtype=jnp.int32)

    tile_rows, tile_cols = _choose_tiles(B, N, itemsize)
    grid = (pl.cdiv(B, tile_rows), pl.cdiv(N, tile_cols))

    if use_hw_prng is None:
        use_hw_prng = (jax.default_backend() == "tpu")

    def run(hw: bool):
        kernel = functools.partial(
            _pos_enc_kernel, p=float(p), training=bool(training), use_hw_prng=hw,
            n_cols_total=N, tile_rows=tile_rows, tile_cols=tile_cols)

        grid_spec = pltpu.PrefetchScalarGridSpec(
            num_scalar_prefetch=1,                                   # seed -> SMEM
            grid=grid,
            in_specs=[
                pl.BlockSpec((tile_rows, tile_cols), lambda r, c, seed: (r, c)),  # x
                pl.BlockSpec((1, tile_cols), lambda r, c, seed: (0, c)),          # pe
            ],
            out_specs=pl.BlockSpec((tile_rows, tile_cols), lambda r, c, seed: (r, c)),
        )

        cost = pl.CostEstimate(
            flops=B * N,                                             # one add per element
            transcendentals=0,
            bytes_accessed=(2 * B * N + N) * itemsize,               # read x, read pe, write out
        )

        out2 = pl.pallas_call(
            kernel,
            out_shape=jax.ShapeDtypeStruct((B, N), x.dtype),
            grid_spec=grid_spec,
            compiler_params=pltpu.CompilerParams(
                dimension_semantics=("parallel", "parallel"),        # tiles independent
                vmem_limit_bytes=32 << 20,                           # tiles budgeted ~12 MiB
            ),
            cost_estimate=cost,
        )(seed_arr, x2, pe2)
        return out2.reshape(B, S, D)

    if training and p > 0.0 and use_hw_prng:
        try:
            return jax.block_until_ready(run(True))
        except Exception:
            # Hardware PRNG not supported in this execution mode (e.g. interpreter):
            # fall back to the counter-based hash path.  Only guards the PRNG attempt.
            return run(False)
    return run(False)


# ----------------------------------------------------------------------------- test

if __name__ == "__main__":
    # Small shapes consistent with the module: batch=2, seq=8, d_model=32.
    B, S, D = 2, 8, 32
    MAX_SEQ = 64
    P_DROP = 0.1

    key = jax.random.PRNGKey(0)
    x = jax.random.normal(key, (B, S, D), dtype=jnp.float32)

    pe = _pe_table(D, MAX_SEQ)
    pe_flat = prepare_pe_flat(pe, S, x.dtype)          # cached at "module init" in real use

    # Eval mode (dropout is identity) — verify against the pure-JAX reference.
    out_eval = positional_encoding_forward(x, pe_flat, p=P_DROP, training=False)
    out_eval = jax.block_until_ready(out_eval)
    ref_eval = x + pe[:, :S, :]
    assert out_eval.shape == (B, S, D)
    assert jnp.allclose(out_eval, ref_eval, atol=1e-6, rtol=1e-6)

    # Train mode (dropout applied inside the kernel).
    # TODO(synk): PyTorch's dropout RNG stream cannot be bit-matched; distribution matches.
    out_train = positional_encoding_forward(x, pe_flat, p=P_DROP, training=True, seed=0)
    out_train = jax.block_until_ready(out_train)
    assert out_train.shape == (B, S, D)
    # Every surviving element must equal ref / (1-p); dropped elements are exactly 0.
    scaled_ref = ref_eval / (1.0 - P_DROP)
    ok = jnp.logical_or(out_train == 0.0, jnp.isclose(out_train, scaled_ref, atol=1e-5))
    assert bool(jnp.all(ok))

    print("KERNEL_OK")
</pallas_src>

<mosaic_0001>
module attributes {stable_mosaic.version = 11 : i64} {
  func.func @_pos_enc_kernel(%arg0: i32, %arg1: i32, %arg2: memref<1xi32, #tpu.memory_space<smem>>, %arg3: memref<2x128xf32, #tpu.memory_space<vmem>>, %arg4: memref<1x128xf32, #tpu.memory_space<vmem>>, %arg5: memref<2x128xf32, #tpu.memory_space<vmem>>) attributes {dimension_semantics = [#tpu.dimension_semantics<parallel>, #tpu.dimension_semantics<parallel>], iteration_bounds = array<i64: 1, 2>, scalar_prefetch = 1 : i64, scratch_operands = 0 : i64, tpu.core_type = #tpu.core_type<tc>, window_params = [{transform_indices = @transform_0, window_bounds = array<i64: 2, 128>}, {transform_indices = @transform_1, window_bounds = array<i64: 1, 128>}, {transform_indices = @transform_2, window_bounds = array<i64: 2, 128>}]} {
    %c0 = arith.constant 0 : index
    %c0_0 = arith.constant 0 : index
    %0 = vector.load %arg3[%c0, %c0_0] : memref<2x128xf32, #tpu.memory_space<vmem>>, vector<2x128xf32>
    %c0_1 = arith.constant 0 : index
    %c0_2 = arith.constant 0 : index
    %1 = vector.load %arg4[%c0_1, %c0_2] : memref<1x128xf32, #tpu.memory_space<vmem>>, vector<1x128xf32>
    %2 = vector.broadcast %1 : vector<1x128xf32> to vector<2x128xf32>
    %3 = arith.addf %0, %2 : vector<2x128xf32>
    %c0_3 = arith.constant 0 : index
    %c0_4 = arith.constant 0 : index
    %4 = vector.load %arg5[%c0_3, %c0_4] : memref<2x128xf32, #tpu.memory_space<vmem>>, vector<2x128xf32>
    tpu.vector_store %arg5[%c0_3, %c0_4], %3 {strides = array<i32>} : memref<2x128xf32, #tpu.memory_space<vmem>>, vector<2x128xf32>,
    return
  }
  func.func @transform_0(%arg0: i32, %arg1: i32, %arg2: memref<1xi32, #tpu.memory_space<smem>>) -> (i32, i32) {
    %c0_i32 = arith.constant 0 : i32
    return %arg0, %arg1 : i32, i32
  }
  func.func @transform_1(%arg0: i32, %arg1: i32, %arg2: memref<1xi32, #tpu.memory_space<smem>>) -> (i32, i32) {
    %c0_i32 = arith.constant 0 : i32
    %c0_i32_0 = arith.constant 0 : i32
    return %c0_i32, %arg1 : i32, i32
  }
  func.func @transform_2(%arg0: i32, %arg1: i32, %arg2: memref<1xi32, #tpu.memory_space<smem>>) -> (i32, i32) {
    %c0_i32 = arith.constant 0 : i32
    return %arg0, %arg1 : i32, i32
  }
}

</mosaic_0001>

<bundles_post_ra>
// kernel: tpu_custom_call.1
= control target key start
LH: loop header
LB: loop body
LE: loop exit
PB: predicated region body
PF: predicated region fallthrough
CT: control target
= control target key end

     0   :  { %9 = vsyncpa [#allocation5], 0  ;;  %s657_s0 = inlined_call_operand.<no memory space> [shape: s32[1], index: 0, kind: input, shape index: {}]   ;;  %s658_s1 = inlined_call_operand.hbm [shape: f32[2,256], index: 1, kind: input, shape index: {}]   ;;  %s659_s2 = inlined_call_operand.vmem [shape: f32[1,256], index: 2, kind: input, shape index: {}]   ;;  %s660_s3 = inlined_call_operand.hbm [shape: f32[2,256], index: 3, kind: output, shape index: {}]  }
   0x1   :  { %11 = vsyncpa [#allocation5 + $0x1], 0 }
   0x2   :  { %12 = vsyncpa [#allocation6], 0 }
   0x3   :  { %14 = vsyncpa [#allocation6 + $0x1], 0  ;;  %s518_s12 = smov 0   ;;  %s520_s13 = smov 0  }
   0x4   :  { %s522_s14 = smov 0   ;;  %s524_s0 = smov 0  }
   0x5   :  { %s526_s15 = smov 0   ;;  %s528_s16 = smov 0  }
   0x6 LB: > { %s310_s17 = sadd.s32 4294967295, %s494_s16   ;;  %s311_s18 = sadd.s32 4294967294, %s494_s16   ;;  %s494_s16 = sphi %s528_s16, %s20_s16   ;;  %s490_s15 = sphi %s526_s15, %s672_s15   ;;  %s486_s0 = sphi %s524_s0, %s671_s0   ;;  %s482_s14 = sphi %s522_s14, %s670_s14   ;;  %s478_s13 = sphi %s520_s13, %s669_s13   ;;  %s474_s12 = sphi %s518_s12, %s668_s12  }
   0x7   : > { %s29_s19 = sadd.s32 1, %s490_s15  ;;  %s41_s20 = sadd.s32 1, %s482_s14 }
   0x8   : > { %p30_p0 = scmp.ge.s32.totalorder %s29_s19, 2  ;;  %p48_p1 = scmp.ne.s32.totalorder %s482_s14, %s478_s13 }
   0x9   : > { %p49_p2 = scmp.eq.s32.totalorder %s494_s16, 0  ;;  %p54_p3 = scmp.ne.s32.totalorder %s478_s13, %s474_s12 }
   0xa   : > { %s674_s19 = smov (%p30_p0, %s29_s19), 0  ;;  %p55_p5 = scmp.eq.s32.totalorder %s310_s17, 0 }
   0xb   : > { %p559_p4 = por %p49_p2, %p48_p1  ;;  %s37_s22 = ssub.s32 %s490_s15, %s674_s19 }
   0xc   : > { %p106_p6 = scmp.eq.s32.totalorder %s310_s17, 1  ;;  %p39_p7 = scmp.eq.s32.totalorder %s37_s22, 0 }
   0xd   : > { %p565_p8 = por %p55_p5, %p54_p3  ;;  %p112_p10 = scmp.eq.s32.totalorder %s311_s18, 1 }
   0xe   : > { %p569_p9 = por %p106_p6, %p48_p1  ;;  %p336_p13 = scmp.lt.s32.totalorder %s494_s16, 2 }
   0xf   : > { %s574_s25 = scalar_select %p39_p7, %s482_s14, %s41_s20  }
  0x10   : > { %p576_p11 = por %p112_p10, %p54_p3  ;;  %s132_s27 = sand.u32 1, %s482_s14  }
  0x11   : > { %s314_s28 = sshll.u32 %s132_s27, 1  ;;  %s315_s29 = sshll.u32 %s490_s15, 5 }
  0x12   : > { %s664_s26 = scalar_select %p576_p11, 1, 0 }
  0x13   : > { %s143_s5 = scalar_lea.hbm %s658_s1, %s315_s29  ;;  %s136_s6 = scalar_lea.vmem [#allocation4], %s314_s28 }
  0x14   : > { %s145_s7 = sshll.u32 %s136_s6, 4  ;;  %p589_p0 = pnand %p336_p13, %p559_p4  ;;  %s146_s7 = int_to_ptr.vmem [resolvable:$true] %s145_s7 }
  0x15   : > { %p316_p1 = scmp.ge.s32.totalorder %s494_s16, 1  ;;  %p156_p2 = scmp.lt.s32.totalorder %s494_s16, 3 }
  0x16   : > { %s133_s9 = scalar_lea.sflag [#allocation5], %s132_s27  ;;  %p388_p3 = pneg %p589_p0 }
  0x17   : > { %s399_s10 = scalar_lea.vmem %s146_s7, 32  ;;  %s496_s11 = smov [#allocation4]  }
  0x18   : > { %p400_p5 = scmp.ne.s32.totalorder %s146_s7, %s399_s10  ;;  %s404_s17 = sshll.u32 %s496_s11, 4  ;;  %s405_s17 = int_to_ptr.vmem [resolvable:$false] %s404_s17 }
  0x19   : > { %s406_s18 = scalar_lea.vmem %s405_s17, 64  ;;  %p407_p10 = scmp.lt.s32.totalorder %s146_s7, %s405_s17 }
  0x1a   : > { %p402_p6 = pnand %p400_p5, %p388_p3  ;;  %p408_p12 = scmp.lt.s32.totalorder %s406_s18, %s399_s10 }
  0x1c   : > { %p403_p7 = pneg %p402_p6  ;;  %p409_p4 = por %p408_p12, %p407_p10 }
  0x1e   : > { %p410_p13 = pnand %p409_p4, %p403_p7 }
  0x20   : > { %413 = shalt.err (!%p410_p13)
}
  0x21   : > { %331 = dma.hbm_to_vmem [thread:$0]  (!%p589_p0), %s143_s5, 32, %s146_s7, %s133_s9  }
  0x22   : > { %p157_p11 = pnand %p316_p1, %p156_p2 }
  0x23   : > { %s604_s20 = sand.u32 (!%p157_p11), 1, %s478_s13  }
  0x24   : > { %160 = sbr.rel (%p157_p11) target bundleno = 68 (0x44), region = 28  ;;  %s317_s21 = sshll.u32 (!%p157_p11), %s604_s20, 1 }
  0x25   : > { %s163_s22 = scalar_lea.sflag (!%p157_p11), [#allocation5], %s604_s20  ;;  %s166_s27 = scalar_lea.vmem (!%p157_p11), [#allocation4], %s317_s21 }
  0x29   : > { %465 = dma.done.wait (%p565_p8), %s163_s22, 32  }
  0x2a   : > { %467 = vsyncadd (%p565_p8), %s163_s22, 4294967264  ;;  %p190_p11 = scmp.lt.s32.totalorder %s486_s0, 1  ;;  %s189_s5 = scalar_lea.vmem [#allocation7], %s317_s21  ;;  %v193_v0 = vld [vmem:[%s166_s27] sm:$0x3] }
  0x2b   : > { %s219_s6 = sshll.u32 %s189_s5, 4  ;;  %s321_s7 = sshll.u32 %s486_s0, 5  ;;  %s220_s6 = int_to_ptr.vmem [resolvable:$true] %s219_s6 }
  0x2c   : > { %s191_s28 = scalar_select %p190_p11, %s486_s0, 1 }
  0x2d   : > { %s217_s9 = scalar_lea.hbm %s660_s3, %s321_s7  ;;  %s204_s10 = scalar_lea.sflag [#allocation6], %s604_s20 }
  0x2e   : > { %s192_s4 = scalar_lea.vmem %s659_s2, %s191_s28  ;;  %s414_s11 = scalar_lea.vmem %s220_s6, 32 }
  0x2f   : > { %v319_v1 = vld [vmem:[%s192_s4] ss:$0 sm:$0xff]  ;;  %p415_p8 = scmp.ne.s32.totalorder %s220_s6, %s414_s11  ;;  %s497_s17 = smov [#allocation7]  }
  0x30   : > { %v201_v2 = vadd.f32 %v319_v1, %v193_v0  ;;  %s418_s18 = sshll.u32 %s497_s17, 4  ;;  %s419_s18 = int_to_ptr.vmem [resolvable:$false] %s418_s18 }
  0x31   : > { %p416_p12 = pnand %p415_p8, %p569_p9  ;;  %s420_s21 = scalar_lea.vmem %s419_s18, 64 }
  0x32   : > { %202 = vst [vmem:[%s189_s5] sm:$0x3] %v201_v2  ;;  %p421_p1 = scmp.lt.s32.totalorder %s220_s6, %s419_s18  ;;  %p422_p2 = scmp.lt.s32.totalorder %s420_s21, %s414_s11 }
  0x33   : > { %p417_p0 = pneg %p416_p12 }
  0x34   : > { %p423_p3 = por %p422_p2, %p421_p1 }
  0x36   : > { %p424_p5 = pnand %p423_p3, %p417_p0 }
  0x38   : > { %427 = shalt.err (!%p424_p5)
}
  0x39   : > { %s428_s0 = scalar_lea.hbm %s217_s9, 32  ;;  %s432_s27 = scalar_lea.hbm %s660_s3, 64 }
  0x3a   : > { %p429_p6 = scmp.ne.s32.totalorder %s217_s9, %s428_s0  ;;  %p433_p4 = scmp.lt.s32.totalorder %s217_s9, %s660_s3 }
  0x3b   : > { %p434_p13 = scmp.lt.s32.totalorder %s432_s27, %s428_s0 }
  0x3c   : > { %p430_p7 = pnand %p429_p6, %p569_p9 }
  0x3d   : > { %p435_p11 = por %p434_p13, %p433_p4 }
  0x3e   : > { %p431_p10 = pneg %p430_p7 }
  0x40   : > { %p436_p8 = pnand %p435_p11, %p431_p10 }
  0x42   : > { %439 = shalt.err (!%p436_p8)
}
  0x43   : > { %326 = dma.vmem_to_hbm [thread:$0]  (%p569_p9), %s220_s6, 32, %s217_s9, %s204_s10  }
  0x44 PF: > { %s231_s30 = sand.u32 1, %s474_s12   ;;  %p666_p12 = scmp.ne.s32.totalorder %s664_s26, 0 }
  0x45   : > { %p667_p0 = scmp.ge.s32.totalorder %s494_s16, 2  ;;  %s232_s4 = scalar_lea.sflag [#allocation6], %s231_s30 }
  0x47   : > { %p333_p1 = pnand %p667_p0, %p666_p12 }
  0x49   : > { %p334_p2 = pneg %p333_p1 }
  0x4b   : > { %469 = dma.done.wait (%p334_p2), %s232_s4, 32  }
  0x4c   : > { %471 = vsyncadd (%p334_p2), %s232_s4, 4294967264  ;;  %s20_s16 = sadd.s32 1, %s494_s16   ;;  %s668_s12 = smov %s478_s13 }
  0x4d   : > { %p17_p3 = scmp.ge.s32.totalorder %s20_s16, 4   ;;  %s669_s13 = smov %s482_s14 }
  0x4e   : > { %s670_s14 = smov %s574_s25  ;;  %s671_s0 = smov %s490_s15 }
  0x4f   : > { %s672_s15 = smov %s674_s19  ;;  %19 = sbr.rel (!%p17_p3) target bundleno = 6 (0x6), region = 76 }
  0x54   :  { %237 = vsyncpa [#allocation5], 1 }
  0x55   :  { %239 = vsyncpa [#allocation5 + $0x1], 1 }
  0x56   :  { %240 = vsyncpa [#allocation6], 1 }
  0x57   :  { %242 = vsyncpa [#allocation6 + $0x1], 1 }

</bundles_post_ra>
